<compile_context>
chip_gen: v5e
topology: v5e:2x2
jax: 0.10.0
libtpu: 0.0.40
codegen_flags: <defaults>
</compile_context>

<pallas_src>
import functools

import jax
import jax.numpy as jnp
from jax.experimental import pallas as pl
from jax.experimental.pallas import tpu as pltpu


def _bilinear_disc_kernel(u_ref, b_ref, bias_ref, out_ref):
    # u_ref:    (B, D)      VMEM f32, same block every grid step (resident)
    # b_ref:    (B, TT, D)  VMEM, streamed tile of b_enc (native dtype)
    # bias_ref: (1,)        SMEM f32 scalar
    # out_ref:  (B, TT)     VMEM f32, lane-dense output tile
    u = u_ref[...]                                     # (B, D) f32
    # In-register upcast (no-op for f32 inputs); accumulate in f32 to match
    # the PyTorch f32 reference regardless of activation dtype.
    b = b_ref[...].astype(jnp.float32)                 # (B, TT, D)
    # scores[b, t] = sum_d b[b, t, d] * u[b, d]  -- VPU mul + XLU lane-reduce
    s = jnp.sum(b * u[:, None, :], axis=-1)            # (B, TT)
    out_ref[...] = (s + bias_ref[0]).astype(out_ref.dtype)


def _choose_t_tile(B, T, D, itemsize, target_bytes=8 * 1024 * 1024,
                   min_steps=4):
    """Pick the T tile so one (B, TT, D) b_enc buffer is ~target_bytes
    (Pallas double-buffers it).  Legal choices: TT == T (full dim), or TT a
    multiple of 128, so both the (B, TT, D) input block and the (B, TT)
    lane-dense output block satisfy the (8,128) constraints.  When tiling is
    needed, cap TT so the grid keeps >= min_steps steps (pipelining /
    megacore balance)."""
    if T <= 128:
        return T
    tt = (target_bytes // max(1, B * D * itemsize)) // 128 * 128
    tt = max(128, int(tt))
    if tt >= T:
        return T
    cap = max(128, (T // min_steps) // 128 * 128)
    return min(tt, cap)


@functools.partial(jax.jit, static_argnames=("t_tile",))
def discriminator_forward(a_enc, b_enc, weight, bias, *, t_tile=None):
    """a_enc: (B, D), b_enc: (B, T, D), weight: (1, D, D), bias: (1,) -> (B, T, 1)."""
    B, D = a_enc.shape
    _, T, _ = b_enc.shape
    w2d = weight.reshape(D, D).astype(jnp.float32)

    # u = a_enc @ W : tiny matmul, computed ONCE (not per b_enc tile); only the
    # big operand b_enc streams through the kernel.
    u = jnp.dot(a_enc.astype(jnp.float32), w2d,
                preferred_element_type=jnp.float32)            # (B, D) f32

    b_itemsize = jnp.dtype(b_enc.dtype).itemsize
    tt = _choose_t_tile(B, T, D, b_itemsize) if t_tile is None else int(t_tile)
    grid = (pl.cdiv(T, tt),)

    flops = 2 * B * T * D                                       # in-kernel contraction
    bytes_accessed = b_itemsize * B * T * D + 4 * (B * D + B * T + 1)

    out2d = pl.pallas_call(
        _bilinear_disc_kernel,
        out_shape=jax.ShapeDtypeStruct((B, T), jnp.float32),
        grid=grid,
        in_specs=[
            pl.BlockSpec((B, D), lambda t: (0, 0)),             # u: VMEM-resident
            pl.BlockSpec((B, tt, D), lambda t: (0, t, 0)),      # b_enc: streamed, native dtype
            pl.BlockSpec(memory_space=pltpu.MemorySpace.SMEM),  # bias scalar
        ],
        out_specs=pl.BlockSpec((B, tt), lambda t: (0, t)),      # lane-dense output
        compiler_params=pltpu.CompilerParams(
            dimension_semantics=("parallel",),                  # megacore-shardable T axis
            vmem_limit_bytes=32 * 1024 * 1024,
        ),
        cost_estimate=pl.CostEstimate(
            flops=flops, transcendentals=0, bytes_accessed=bytes_accessed),
    )(u, b_enc, bias.astype(jnp.float32))

    # Trailing singleton added outside the kernel so in-kernel stores stay
    # unmasked / lane-dense.
    return out2d[..., None]


def init_params(key, d_model):
    """Deterministic init matching the PyTorch module:
    xavier_uniform_ on the (1, D, D) bilinear weight, bias filled with 0."""
    # torch xavier_uniform_ on a (1, D, D) tensor:
    #   fan_in  = shape[1] * prod(shape[2:]) = D * D
    #   fan_out = shape[0] * prod(shape[2:]) = 1 * D
    fan_in = d_model * d_model
    fan_out = d_model
    bound = (6.0 / (fan_in + fan_out)) ** 0.5
    weight = jax.random.uniform(
        key, (1, d_model, d_model), dtype=jnp.float32, minval=-bound, maxval=bound
    )
    bias = jnp.zeros((1,), dtype=jnp.float32)
    return weight, bias


def reference_forward(a_enc, b_enc, weight, bias):
    """Pure-JAX reference replicating nn.Bilinear on the expanded a_enc."""
    w = weight[0]                                                  # (D, D)
    u = jnp.dot(a_enc.astype(jnp.float32), w,
                preferred_element_type=jnp.float32)                # (B, D)
    s = jnp.einsum("btd,bd->bt", b_enc.astype(jnp.float32), u,
                   preferred_element_type=jnp.float32) + bias[0]
    return s[..., None]


if __name__ == "__main__":
    key = jax.random.PRNGKey(0)
    keys = jax.random.split(key, 9)

    # --- Case 1: tiny demo shape from the module (B=2, T=8, D=32) -----------
    B, T, D = 2, 8, 32
    weight, bias = init_params(keys[0], D)
    a_enc = jax.random.normal(keys[1], (B, D), dtype=jnp.float32)
    b_enc = jax.random.normal(keys[2], (B, T, D), dtype=jnp.float32)

    scores = discriminator_forward(a_enc, b_enc, weight, bias)
    scores = jax.block_until_ready(scores)

    ref = reference_forward(a_enc, b_enc, weight, bias)
    assert scores.shape == (B, T, 1), scores.shape
    assert jnp.allclose(scores, ref, atol=1e-4, rtol=1e-4), "mismatch vs reference (tiny)"

    # --- Case 2: lane-aligned shape with T tiling + remainder tile ----------
    #   B=2, T=260, D=128 with t_tile=128 -> grid of 3 steps incl. a masked
    #   remainder tile; exercises the pipelined / partial-tile path.
    B2, T2, D2 = 2, 260, 128
    weight2, bias2 = init_params(keys[3], D2)
    a_enc2 = jax.random.normal(keys[4], (B2, D2), dtype=jnp.float32)
    b_enc2 = jax.random.normal(keys[5], (B2, T2, D2), dtype=jnp.float32)

    scores2 = discriminator_forward(a_enc2, b_enc2, weight2, bias2, t_tile=128)
    scores2 = jax.block_until_ready(scores2)

    ref2 = reference_forward(a_enc2, b_enc2, weight2, bias2)
    assert scores2.shape == (B2, T2, 1), scores2.shape
    assert jnp.allclose(scores2, ref2, atol=1e-4, rtol=1e-4), "mismatch vs reference (tiled)"

    # --- Case 3: bf16 activations, native-dtype streaming path --------------
    #   b_enc stays bf16 all the way into the kernel (no wrapper upcast);
    #   accumulation is f32 inside the kernel.
    B3, T3, D3 = 2, 256, 128
    weight3, bias3 = init_params(keys[6], D3)
    a_enc3 = jax.random.normal(keys[7], (B3, D3), dtype=jnp.float32).astype(jnp.bfloat16)
    b_enc3 = jax.random.normal(keys[8], (B3, T3, D3), dtype=jnp.float32).astype(jnp.bfloat16)

    scores3 = discriminator_forward(a_enc3, b_enc3, weight3, bias3)
    scores3 = jax.block_until_ready(scores3)

    ref3 = reference_forward(a_enc3, b_enc3, weight3, bias3)
    assert scores3.shape == (B3, T3, 1), scores3.shape
    assert jnp.allclose(scores3, ref3, atol=1e-2, rtol=1e-2), "mismatch vs reference (bf16)"

    print("KERNEL_OK")
</pallas_src>

<mosaic_0001>
module attributes {stable_mosaic.version = 11 : i64} {
  func.func @_bilinear_disc_kernel(%arg0: i32, %arg1: memref<2x32xf32, #tpu.memory_space<vmem>>, %arg2: memref<2x8x32xf32, #tpu.memory_space<vmem>>, %arg3: memref<1xf32, #tpu.memory_space<smem>>, %arg4: memref<2x8xf32, #tpu.memory_space<vmem>>) attributes {dimension_semantics = [#tpu.dimension_semantics<parallel>], iteration_bounds = array<i64: 1>, scalar_prefetch = 0 : i64, scratch_operands = 0 : i64, tpu.core_type = #tpu.core_type<tc>, window_params = [{pipeline_mode = #tpu.pipeline_mode<synchronous>, transform_indices = @transform_0, window_bounds = array<i64: 2, 32>}, {transform_indices = @transform_1, window_bounds = array<i64: 2, 8, 32>}, {transform_indices = @transform_2, window_bounds = array<i64: 1>}, {transform_indices = @transform_3, window_bounds = array<i64: 2, 8>}]} {
    %c0 = arith.constant 0 : index
    %c0_0 = arith.constant 0 : index
    %0 = vector.load %arg1[%c0, %c0_0] : memref<2x32xf32, #tpu.memory_space<vmem>>, vector<2x32xf32>
    %c0_1 = arith.constant 0 : index
    %c0_2 = arith.constant 0 : index
    %c0_3 = arith.constant 0 : index
    %1 = vector.load %arg2[%c0_1, %c0_2, %c0_3] : memref<2x8x32xf32, #tpu.memory_space<vmem>>, vector<2x8x32xf32>
    %2 = vector.shape_cast %0 : vector<2x32xf32> to vector<2x1x32xf32>
    %3 = vector.broadcast %2 : vector<2x1x32xf32> to vector<2x8x32xf32>
    %4 = arith.mulf %1, %3 : vector<2x8x32xf32>
    %cst = arith.constant dense<0.000000e+00> : vector<2x8xf32>
    %5 = vector.multi_reduction <add>, %4, %cst [2] : vector<2x8x32xf32> to vector<2x8xf32>
    %c0_4 = arith.constant 0 : index
    %6 = memref.load %arg3[%c0_4] : memref<1xf32, #tpu.memory_space<smem>>
    %7 = vector.broadcast %6 : f32 to vector<2x8xf32>
    %8 = arith.addf %5, %7 : vector<2x8xf32>
    %c0_5 = arith.constant 0 : index
    %c0_6 = arith.constant 0 : index
    %9 = vector.load %arg4[%c0_5, %c0_6] : memref<2x8xf32, #tpu.memory_space<vmem>>, vector<2x8xf32>
    tpu.vector_store %arg4[%c0_5, %c0_6], %8 {strides = array<i32>} : memref<2x8xf32, #tpu.memory_space<vmem>>, vector<2x8xf32>,
    return
  }
  func.func @transform_0(%arg0: i32) -> (i32, i32) {
    %c0_i32 = arith.constant 0 : i32
    %c0_i32_0 = arith.constant 0 : i32
    %c0_i32_1 = arith.constant 0 : i32
    return %c0_i32, %c0_i32_0 : i32, i32
  }
  func.func @transform_1(%arg0: i32) -> (i32, i32, i32) {
    %c0_i32 = arith.constant 0 : i32
    %c0_i32_0 = arith.constant 0 : i32
    %c0_i32_1 = arith.constant 0 : i32
    return %c0_i32, %arg0, %c0_i32_0 : i32, i32, i32
  }
  func.func @transform_2(%arg0: i32) -> i32 {
    %c0_i32 = arith.constant 0 : i32
    %c0_i32_0 = arith.constant 0 : i32
    return %c0_i32 : i32
  }
  func.func @transform_3(%arg0: i32) -> (i32, i32) {
    %c0_i32 = arith.constant 0 : i32
    %c0_i32_0 = arith.constant 0 : i32
    return %c0_i32, %arg0 : i32, i32
  }
}

</mosaic_0001>

<bundles_post_ra>
// kernel: discriminator_forward.1
= control target key start
LH: loop header
LB: loop body
LE: loop exit
PB: predicated region body
PF: predicated region fallthrough
CT: control target
= control target key end

     0   :  { %s128_s0 = inlined_call_operand.vmem [shape: f32[2,32], index: 0, kind: input, shape index: {}]   ;;  %s129_s1 = inlined_call_operand.vmem [shape: f32[2,8,32], index: 1, kind: input, shape index: {}]   ;;  %s130_s2 = inlined_call_operand.<no memory space> [shape: f32[1], index: 2, kind: input, shape index: {}]   ;;  %s131_s3 = inlined_call_operand.hbm [shape: f32[2,8], index: 3, kind: output, shape index: {}]  }
   0x1   :  { %v16_v0 = vld [vmem:[%s128_s0] sm:$0x3] }
   0x2   :  { %v17_v1 = vld [vmem:[%s129_s1] sm:$0xff]  ;;  %v21_v2 = vperm.slane %v16_v0, 0  ;;  %v20_v3 = vrot.slane %v16_v0, 1 }
   0x3   :  { %9 = vsyncpa [#allocation4], 0  ;;  %vm27_vm0 = vcmask 261120   ;;  %v18_v6 = vld [vmem:[%s129_s1 + $0x8] sm:$0xff]  ;;  %v40_v11 = vlaneseq  ;;  %v35_v12 = vstv %s130_s2  ;;  %s92_s19 = smov [#allocation3]   ;;  %s56_s1 = sshll.u32 %s131_s3, 4  ;;  %s57_s1 = int_to_ptr.hbm [resolvable:$true] %s56_s1 }
   0x4   :  { %v25_v4 = vmul.f32 %v21_v2, %v17_v1  ;;  %v22_v5 = vperm.slane %v20_v3, 0  ;;  %s54_s20 = sshll.u32 %s92_s19, 4  ;;  %vm44_vm1 = vcmask 1041409   ;;  %vm47_vm2 = vcmask 58368   ;;  %s55_s20 = int_to_ptr.vmem [resolvable:$true] %s54_s20 }
   0x5   :  { %v41_v13 = vand.u32 127, %v40_v11 }
   0x6   :  { %v28_v7 = vsel %vm27_vm0, %v25_v4, 0.0  ;;  %v26_v8 = vmul.f32 %v22_v5, %v18_v6 }
   0x7   :  { %29 = vadd.xlane.f32.xlu0 %v28_v7 }
   0x8   :  { %v31_v9 = vsel %vm27_vm0, %v26_v8, 0.0 }
   0xf   :  { %32 = vadd.xlane.f32.xlu0 %v31_v9 }
  0x7a   :  { %v30_v10 = vpop.xlane.xlu0 %29 }
  0x7b   :  { %v36_v14 = vadd.f32 %v35_v12, %v30_v10 }
  0x7d   :  { %v42_v17 = vperm.slane %v36_v14, %v41_v13 }
  0x82   :  { %v33_v15 = vpop.xlane.xlu0 %32 }
  0x83   :  { %v37_v16 = vadd.f32 %v35_v12, %v33_v15 }
  0x85   :  { %v43_v18 = vperm.slane %v37_v16, %v41_v13 }
  0x87   :  { %v45_v19 = vsel %vm44_vm1, %v43_v18, %v42_v17 }
  0x88   :  { %48 = vst.msk [vmem:[#allocation3] sm:$0x3] %vm47_vm2, %v45_v19 }
  0x89   :  { %59 = dma.vmem_to_hbm [thread:$0]  %s55_s20, 32, %s57_s1, [#allocation4]  }
  0x8a   :  { %90 = dma.done.wait [#allocation4], 32  }
  0x8b   :  { %91 = vsyncadd [#allocation4], 4294967264 }
  0x8c   :  { %64 = vsyncpa [#allocation4], 1 }

</bundles_post_ra>
